<compile_context>
chip_gen: v6e
topology: v6e:2x2x1
jax: 0.10.0
libtpu: 0.0.40
codegen_flags: <defaults>
</compile_context>

<pallas_src>
import jax
import jax.numpy as jnp
from jax.experimental import pallas as pl
from jax.experimental.pallas import tpu as pltpu


def dqn_kernel(x_ref, w1_ref, b1_ref, w2_ref, b2_ref, w3_ref, b3_ref, out_ref):
    # layer1 + ReLU (bf16 operands -> f32 accumulator, elementwise in f32)
    h1 = jnp.dot(x_ref[...], w1_ref[...], preferred_element_type=jnp.float32)
    h1 = jnp.maximum(h1 + b1_ref[...], 0.0)
    # layer2 + ReLU
    h2 = jnp.dot(h1.astype(w2_ref.dtype), w2_ref[...],
                 preferred_element_type=jnp.float32)
    h2 = jnp.maximum(h2 + b2_ref[...], 0.0)
    # layer3 (Q-values, no activation) -> 8-lane-padded output slab
    q = jnp.dot(h2.astype(w3_ref.dtype), w3_ref[...],
                preferred_element_type=jnp.float32)
    out_ref[...] = (q + b3_ref[...]).astype(out_ref.dtype)


def prepare_dqn_params(params):
    """One-time (per parameter update) weight prep, hoisted out of the forward
    path: bf16 casts for the matmul operands and zero-pad of the Q-head to a
    sublane multiple (8) so the output slab stays small."""
    w1, b1, w2, b2, w3, b3 = params
    n_actions = w3.shape[1]
    n_out_pad = ((n_actions + 7) // 8) * 8
    w3p = jnp.zeros((w3.shape[0], n_out_pad), jnp.float32).at[:, :n_actions].set(w3)
    b3p = jnp.zeros((1, n_out_pad), jnp.float32).at[:, :n_actions].set(
        b3.reshape(1, -1))
    return (w1.astype(jnp.bfloat16), b1,
            w2.astype(jnp.bfloat16), b2,
            w3p.astype(jnp.bfloat16), b3p,
            n_actions)


def dqn_forward(x, prepared, *, tb_max=4096):
    """Fused 3-layer MLP forward. x: [B, D_in] float32 (or bf16).
    `prepared` comes from prepare_dqn_params. Returns [B, n_actions] f32."""
    w1b, b1, w2b, b2, w3b, b3p, n_actions = prepared
    B, d_in = x.shape
    n_out_pad = w3b.shape[1]

    # Pad the batch only to a multiple of 8 (sublane); the last grid block may
    # be partial and Pallas masks the out-of-bounds rows on store.
    bp = max(8, ((B + 7) // 8) * 8)
    if bp != B:
        x = jnp.pad(x, ((0, bp - B), (0, 0)))
    xb = x.astype(jnp.bfloat16)

    # Batch-tile selection:
    #   - tiny batches: one grid step covering the whole padded batch
    #   - otherwise: target a 2-step grid (v7x megacore shards it across both
    #     TensorCores), tile rounded up to a multiple of 128 (MXU M-dim),
    #     capped at tb_max for v5e scoped-VMEM headroom.
    if bp <= 256:
        tb = bp
    else:
        tb = min(tb_max, ((pl.cdiv(bp, 2) + 127) // 128) * 128)
    grid = pl.cdiv(bp, tb)

    # Weight/bias blocks never change index -> DMA'd once, VMEM-resident.
    pinned = lambda shape: pl.BlockSpec(shape, lambda i: (0, 0))

    q_pad = pl.pallas_call(
        dqn_kernel,
        out_shape=jax.ShapeDtypeStruct((bp, n_out_pad), jnp.float32),
        grid_spec=pltpu.PrefetchScalarGridSpec(
            num_scalar_prefetch=0,
            grid=(grid,),
            in_specs=[
                pl.BlockSpec((tb, d_in), lambda i: (i, 0)),   # x batch tile
                pinned(w1b.shape), pinned(b1.shape),
                pinned(w2b.shape), pinned(b2.shape),
                pinned(w3b.shape), pinned(b3p.shape),
            ],
            out_specs=pl.BlockSpec((tb, n_out_pad), lambda i: (i, 0)),
        ),
        compiler_params=pltpu.CompilerParams(
            dimension_semantics=("parallel",)),
    )(xb, w1b, b1, w2b, b2, w3b, b3p)

    return q_pad[:B, :n_actions]


def init_dqn_params(key, input_dim, fc1_dims, fc2_dims, n_actions):
    """Init mirroring the PyTorch module: weights ~ N(0, 0.1) (explicit in the
    spec), biases keep PyTorch's default U(-1/sqrt(fan_in), +1/sqrt(fan_in))."""
    ks = jax.random.split(key, 6)

    def w(k, fan_in, fan_out):
        # stored transposed: [in, out]
        return 0.1 * jax.random.normal(k, (fan_in, fan_out), dtype=jnp.float32)

    def b(k, fan_in, fan_out):
        bound = 1.0 / jnp.sqrt(float(fan_in))
        return jax.random.uniform(
            k, (1, fan_out), minval=-bound, maxval=bound, dtype=jnp.float32)

    w1 = w(ks[0], input_dim, fc1_dims)
    b1 = b(ks[1], input_dim, fc1_dims)
    w2 = w(ks[2], fc1_dims, fc2_dims)
    b2 = b(ks[3], fc1_dims, fc2_dims)
    w3 = w(ks[4], fc2_dims, n_actions)
    b3 = b(ks[5], fc2_dims, n_actions)
    return (w1, b1, w2, b2, w3, b3)


def dqn_reference(x, params):
    """Pure-JAX reference with the same bf16-operand / f32-accumulate recipe.
    NOTE: vs. a pure-f32 PyTorch DQN, expect ~1e-2 relative error on Q-values
    from the bf16 operand quantization (acceptable for DQN training)."""
    w1, b1, w2, b2, w3, b3 = params
    xb = x.astype(jnp.bfloat16)
    h1 = jnp.dot(xb, w1.astype(jnp.bfloat16),
                 preferred_element_type=jnp.float32) + b1
    h1 = jnp.maximum(h1, 0.0)
    h2 = jnp.dot(h1.astype(jnp.bfloat16), w2.astype(jnp.bfloat16),
                 preferred_element_type=jnp.float32) + b2
    h2 = jnp.maximum(h2, 0.0)
    return jnp.dot(h2.astype(jnp.bfloat16), w3.astype(jnp.bfloat16),
                   preferred_element_type=jnp.float32) + b3


if __name__ == "__main__":
    key = jax.random.PRNGKey(0)
    kx, kp, kx2, kx3 = jax.random.split(key, 4)

    # Small shapes consistent with the module: input_dims=(8,), fc1=32, fc2=32,
    # n_actions=4.
    D_IN, FC1, FC2, N_ACT = 8, 32, 32, 4
    params = init_dqn_params(kp, D_IN, FC1, FC2, N_ACT)
    prepared = prepare_dqn_params(params)          # hoisted weight prep
    fwd = jax.jit(lambda x: dqn_forward(x, prepared))

    # Case 1: tiny inference batch (B=2) -- single 8-row grid step.
    B1 = 2
    x1 = jax.random.normal(kx, (B1, D_IN), dtype=jnp.float32)
    q1 = fwd(x1)
    jax.block_until_ready(q1)
    q1_ref = dqn_reference(x1, params)
    assert q1.shape == (B1, N_ACT)
    assert jnp.allclose(q1, q1_ref, atol=1e-4, rtol=1e-4)

    # Case 2: replay-buffer-sized batch -> 2-step grid (tb=256), weights stay
    # VMEM-resident, v7x megacore shards the two steps across TensorCores.
    B2 = 512
    x2 = jax.random.normal(kx2, (B2, D_IN), dtype=jnp.float32)
    q2 = fwd(x2)
    jax.block_until_ready(q2)
    q2_ref = dqn_reference(x2, params)
    assert q2.shape == (B2, N_ACT)
    assert jnp.allclose(q2, q2_ref, atol=1e-4, rtol=1e-4)

    # Case 3: non-dividing batch (B=1000, tb=512) exercising the masked
    # partial last block (no over-padding of the batch to a tile multiple).
    B3 = 1000
    x3 = jax.random.normal(kx3, (B3, D_IN), dtype=jnp.float32)
    q3 = fwd(x3)
    jax.block_until_ready(q3)
    q3_ref = dqn_reference(x3, params)
    assert q3.shape == (B3, N_ACT)
    assert jnp.allclose(q3, q3_ref, atol=1e-4, rtol=1e-4)

    print("KERNEL_OK")
</pallas_src>

<mosaic_0001>
module attributes {stable_mosaic.version = 11 : i64} {
  func.func @dqn_kernel(%arg0: i32, %arg1: memref<8x8xbf16, #tpu.memory_space<vmem>>, %arg2: memref<8x32xbf16, #tpu.memory_space<vmem>>, %arg3: memref<1x32xf32, #tpu.memory_space<vmem>>, %arg4: memref<32x32xbf16, #tpu.memory_space<vmem>>, %arg5: memref<1x32xf32, #tpu.memory_space<vmem>>, %arg6: memref<32x8xbf16, #tpu.memory_space<vmem>>, %arg7: memref<1x8xf32, #tpu.memory_space<vmem>>, %arg8: memref<8x8xf32, #tpu.memory_space<vmem>>) attributes {dimension_semantics = [#tpu.dimension_semantics<parallel>], iteration_bounds = array<i64: 1>, scalar_prefetch = 0 : i64, scratch_operands = 0 : i64, tpu.core_type = #tpu.core_type<tc>, window_params = [{transform_indices = @transform_0, window_bounds = array<i64: 8, 8>}, {pipeline_mode = #tpu.pipeline_mode<synchronous>, transform_indices = @transform_1, window_bounds = array<i64: 8, 32>}, {pipeline_mode = #tpu.pipeline_mode<synchronous>, transform_indices = @transform_2, window_bounds = array<i64: 1, 32>}, {pipeline_mode = #tpu.pipeline_mode<synchronous>, transform_indices = @transform_3, window_bounds = array<i64: 32, 32>}, {pipeline_mode = #tpu.pipeline_mode<synchronous>, transform_indices = @transform_4, window_bounds = array<i64: 1, 32>}, {pipeline_mode = #tpu.pipeline_mode<synchronous>, transform_indices = @transform_5, window_bounds = array<i64: 32, 8>}, {pipeline_mode = #tpu.pipeline_mode<synchronous>, transform_indices = @transform_6, window_bounds = array<i64: 1, 8>}, {transform_indices = @transform_7, window_bounds = array<i64: 8, 8>}]} {
    %c0 = arith.constant 0 : index
    %c0_0 = arith.constant 0 : index
    %0 = vector.load %arg1[%c0, %c0_0] : memref<8x8xbf16, #tpu.memory_space<vmem>>, vector<8x8xbf16>
    %c0_1 = arith.constant 0 : index
    %c0_2 = arith.constant 0 : index
    %1 = vector.load %arg2[%c0_1, %c0_2] : memref<8x32xbf16, #tpu.memory_space<vmem>>, vector<8x32xbf16>
    %cst = arith.constant dense<0.000000e+00> : vector<8x32xf32>
    %2 = tpu.matmul %0, %1, %cst {dimension_numbers = #tpu.dot_dimension_numbers<[1], [0], [0], [1], [0, 0, 1, 1], [], []>} : vector<8x8xbf16>, vector<8x32xbf16>, vector<8x32xf32> -> vector<8x32xf32>
    %c0_3 = arith.constant 0 : index
    %c0_4 = arith.constant 0 : index
    %3 = vector.load %arg3[%c0_3, %c0_4] : memref<1x32xf32, #tpu.memory_space<vmem>>, vector<1x32xf32>
    %4 = vector.broadcast %3 : vector<1x32xf32> to vector<8x32xf32>
    %5 = arith.addf %2, %4 : vector<8x32xf32>
    %cst_5 = arith.constant 0.000000e+00 : f32
    %6 = vector.broadcast %cst_5 : f32 to vector<8x32xf32>
    %7 = arith.maximumf %5, %6 : vector<8x32xf32>
    %8 = arith.truncf %7 : vector<8x32xf32> to vector<8x32xbf16>
    %c0_6 = arith.constant 0 : index
    %c0_7 = arith.constant 0 : index
    %9 = vector.load %arg4[%c0_6, %c0_7] : memref<32x32xbf16, #tpu.memory_space<vmem>>, vector<32x32xbf16>
    %cst_8 = arith.constant dense<0.000000e+00> : vector<8x32xf32>
    %10 = tpu.matmul %8, %9, %cst_8 {dimension_numbers = #tpu.dot_dimension_numbers<[1], [0], [0], [1], [0, 0, 1, 1], [], []>} : vector<8x32xbf16>, vector<32x32xbf16>, vector<8x32xf32> -> vector<8x32xf32>
    %c0_9 = arith.constant 0 : index
    %c0_10 = arith.constant 0 : index
    %11 = vector.load %arg5[%c0_9, %c0_10] : memref<1x32xf32, #tpu.memory_space<vmem>>, vector<1x32xf32>
    %12 = vector.broadcast %11 : vector<1x32xf32> to vector<8x32xf32>
    %13 = arith.addf %10, %12 : vector<8x32xf32>
    %cst_11 = arith.constant 0.000000e+00 : f32
    %14 = vector.broadcast %cst_11 : f32 to vector<8x32xf32>
    %15 = arith.maximumf %13, %14 : vector<8x32xf32>
    %16 = arith.truncf %15 : vector<8x32xf32> to vector<8x32xbf16>
    %c0_12 = arith.constant 0 : index
    %c0_13 = arith.constant 0 : index
    %17 = vector.load %arg6[%c0_12, %c0_13] : memref<32x8xbf16, #tpu.memory_space<vmem>>, vector<32x8xbf16>
    %cst_14 = arith.constant dense<0.000000e+00> : vector<8x8xf32>
    %18 = tpu.matmul %16, %17, %cst_14 {dimension_numbers = #tpu.dot_dimension_numbers<[1], [0], [0], [1], [0, 0, 1, 1], [], []>} : vector<8x32xbf16>, vector<32x8xbf16>, vector<8x8xf32> -> vector<8x8xf32>
    %c0_15 = arith.constant 0 : index
    %c0_16 = arith.constant 0 : index
    %19 = vector.load %arg7[%c0_15, %c0_16] : memref<1x8xf32, #tpu.memory_space<vmem>>, vector<1x8xf32>
    %20 = vector.broadcast %19 : vector<1x8xf32> to vector<8x8xf32>
    %21 = arith.addf %18, %20 : vector<8x8xf32>
    %c0_17 = arith.constant 0 : index
    %c0_18 = arith.constant 0 : index
    %22 = vector.load %arg8[%c0_17, %c0_18] : memref<8x8xf32, #tpu.memory_space<vmem>>, vector<8x8xf32>
    tpu.vector_store %arg8[%c0_17, %c0_18], %21 {strides = array<i32>} : memref<8x8xf32, #tpu.memory_space<vmem>>, vector<8x8xf32>,
    return
  }
  func.func @transform_0(%arg0: i32) -> (i32, i32) {
    %c0_i32 = arith.constant 0 : i32
    %c0_i32_0 = arith.constant 0 : i32
    return %arg0, %c0_i32 : i32, i32
  }
  func.func @transform_1(%arg0: i32) -> (i32, i32) {
    %c0_i32 = arith.constant 0 : i32
    %c0_i32_0 = arith.constant 0 : i32
    %c0_i32_1 = arith.constant 0 : i32
    return %c0_i32, %c0_i32_0 : i32, i32
  }
  func.func @transform_2(%arg0: i32) -> (i32, i32) {
    %c0_i32 = arith.constant 0 : i32
    %c0_i32_0 = arith.constant 0 : i32
    %c0_i32_1 = arith.constant 0 : i32
    return %c0_i32, %c0_i32_0 : i32, i32
  }
  func.func @transform_3(%arg0: i32) -> (i32, i32) {
    %c0_i32 = arith.constant 0 : i32
    %c0_i32_0 = arith.constant 0 : i32
    %c0_i32_1 = arith.constant 0 : i32
    return %c0_i32, %c0_i32_0 : i32, i32
  }
  func.func @transform_4(%arg0: i32) -> (i32, i32) {
    %c0_i32 = arith.constant 0 : i32
    %c0_i32_0 = arith.constant 0 : i32
    %c0_i32_1 = arith.constant 0 : i32
    return %c0_i32, %c0_i32_0 : i32, i32
  }
  func.func @transform_5(%arg0: i32) -> (i32, i32) {
    %c0_i32 = arith.constant 0 : i32
    %c0_i32_0 = arith.constant 0 : i32
    %c0_i32_1 = arith.constant 0 : i32
    return %c0_i32, %c0_i32_0 : i32, i32
  }
  func.func @transform_6(%arg0: i32) -> (i32, i32) {
    %c0_i32 = arith.constant 0 : i32
    %c0_i32_0 = arith.constant 0 : i32
    %c0_i32_1 = arith.constant 0 : i32
    return %c0_i32, %c0_i32_0 : i32, i32
  }
  func.func @transform_7(%arg0: i32) -> (i32, i32) {
    %c0_i32 = arith.constant 0 : i32
    %c0_i32_0 = arith.constant 0 : i32
    return %arg0, %c0_i32 : i32, i32
  }
}

</mosaic_0001>

<bundles_post_ra>
// kernel: _lambda_.1
= control target key start
LH: loop header
LB: loop body
LE: loop exit
PB: predicated region body
PF: predicated region fallthrough
CT: control target
= control target key end

     0   :  { %12 = vsyncpa [#allocation3], 0  ;;  %s456_s0 = inlined_call_operand.vmem [shape: bf16[8,8], index: 0, kind: input, shape index: {}]   ;;  %s457_s1 = inlined_call_operand.hbm [shape: bf16[8,32], index: 1, kind: input, shape index: {}]   ;;  %s458_s2 = inlined_call_operand.hbm [shape: f32[1,32], index: 2, kind: input, shape index: {}]   ;;  %s459_s3 = inlined_call_operand.hbm [shape: bf16[32,32], index: 3, kind: input, shape index: {}]   ;;  %s460_s4 = inlined_call_operand.vmem [shape: f32[1,32], index: 4, kind: input, shape index: {}]   ;;  %s461_s5 = inlined_call_operand.vmem [shape: bf16[32,8], index: 5, kind: input, shape index: {}]   ;;  %s462_s6 = inlined_call_operand.vmem [shape: f32[1,8], index: 6, kind: input, shape index: {}]   ;;  %s463_s7 = inlined_call_operand.vmem [shape: f32[8,8], index: 7, kind: output, shape index: {}]  }
   0x1   :  { %13 = vsyncpa [#allocation5], 0  ;;  %s380_s24 = smov [#allocation4]   ;;  %s381_s26 = smov [#allocation2]  }
   0x2   :  { %s32_s25 = sshll.u32 %s380_s24, 4  ;;  %s22_s27 = sshll.u32 %s381_s26, 4  ;;  %s33_s25 = int_to_ptr.vmem [resolvable:$true] %s32_s25  ;;  %s23_s27 = int_to_ptr.vmem [resolvable:$true] %s22_s27 }
   0x3   :  { %s324_s28 = scalar_lea.vmem %s33_s25, 16  ;;  %s328_s29 = scalar_lea.vmem %s33_s25, 32 }
   0x4   :  { %p325_p0 = scmp.ne.s32.totalorder %s33_s25, %s324_s28  ;;  %p329_p1 = scmp.lt.s32.totalorder %s33_s25, %s33_s25 }
   0x5   :  { %p330_p2 = scmp.lt.s32.totalorder %s328_s29, %s324_s28 }
   0x7   :  { %p331_p3 = por %p330_p2, %p329_p1 }
   0x9   :  { %p332_p4 = pnand %p331_p3, %p325_p0 }
   0xb   :  { %335 = shalt.err (!%p332_p4)
}
   0xc   :  { %35 = dma.hbm_to_vmem [thread:$0]  %s458_s2, 16, %s33_s25, [#allocation5]  }
   0xd   :  { %s344_s9 = scalar_lea.vmem %s23_s27, 64  ;;  %p349_p6 = scmp.lt.s32.totalorder %s23_s27, %s23_s27 }
   0xe   :  { %p345_p5 = scmp.ne.s32.totalorder %s23_s27, %s344_s9  ;;  %p350_p7 = scmp.lt.s32.totalorder %s344_s9, %s344_s9 }
  0x10   :  { %p351_p8 = por %p350_p7, %p349_p6 }
  0x12   :  { %p352_p9 = pnand %p351_p8, %p345_p5 }
  0x14   :  { %355 = shalt.err (!%p352_p9)
}
  0x15   :  { %25 = dma.hbm_to_vmem [thread:$0]  %s457_s1, 64, %s23_s27, [#allocation3]  }
  0x16   :  { %s382_s12 = smov [#allocation6]  }
  0x17   :  { %s41_s13 = sshll.u32 %s382_s12, 4  ;;  %s42_s13 = int_to_ptr.vmem [resolvable:$true] %s41_s13 }
  0x18   :  { %s364_s14 = scalar_lea.vmem %s42_s13, 256  ;;  %p369_p11 = scmp.lt.s32.totalorder %s42_s13, %s42_s13 }
  0x19   :  { %p365_p10 = scmp.ne.s32.totalorder %s42_s13, %s364_s14  ;;  %p370_p12 = scmp.lt.s32.totalorder %s364_s14, %s364_s14 }
  0x1b   :  { %p371_p13 = por %p370_p12, %p369_p11 }
  0x1d   :  { %p372_p0 = pnand %p371_p13, %p365_p10 }
  0x1f   :  { %375 = shalt.err (!%p372_p0)
}
  0x20   :  { %s383_s2 = smov 64   ;;  %s384_s15 = smov 4  }
  0x21   :  { %47 = dma.hbm_to_vmem [thread:$0]  %s459_s3, 256, %s42_s13, [#allocation5], %s383_s2, %s383_s2, %s384_s15  }
  0x22   :  { %376 = dma.done.wait [#allocation3], 64  }
  0x23   :  { %377 = vsyncadd [#allocation3], 4294967232 }
  0x24   :  { %378 = dma.done.wait [#allocation5], 272  }
  0x25   :  { %379 = vsyncadd [#allocation5], 4294967024  ;;  %v385_v0 = vmov 0.0   ;;  %vm386_vm0 = vmmov 0   ;;  %vm77_vm1 = vcmask 1043456   ;;  %vm73_vm2 = vcmask 64512  }
  0x26   :  { %283 = vmatprep.subr.bf16.mxu0 %v385_v0  ;;  %285 = vmatprep.mubr.msk.bf16.mxu0 %vm386_vm0, %v385_v0  ;;  %v65_v1 = vld [vmem:[#allocation2] sm:$0xf]  ;;  %v312_v4 = vld [vmem:[#allocation6 + $0x8] sm:$0xff]   ;;  %v313_v5 = vld [vmem:[#allocation6] sm:$0xff]   ;;  %vm146_vm3 = vcmask 261120  }
  0x27   :  { %289 = vmatprep.subr.bf16.mxu1 %v385_v0  ;;  %293 = vmatprep.mubr.msk.bf16.mxu1 %vm386_vm0, %v385_v0  ;;  %v64_v2 = vld [vmem:[%s456_s0] sm:$0xf]  ;;  %v79_v3 = vsel %vm77_vm1, %v65_v1, 0  ;;  %v314_v6 = vld [vmem:[%s461_s5 + $0x8] sm:$0xff]   ;;  %v265_v7 = vld [vmem:[#allocation4] ss:$0 sm:$0xff] }
  0x28   :  { %284 = vmatpush3.bf16.msra.mxu0 %v79_v3  ;;  %290 = vmatpush3.bf16.msra.mxu1 %v312_v4  ;;  %v315_v15 = vld [vmem:[%s461_s5] sm:$0xff]  }
  0x29   :  { %297 = vmatprep.subr.bf16.mxu0 %v385_v0  ;;  %291 = vmatprep.subr.bf16.mxu1 %v385_v0  ;;  %v267_v16 = vld [vmem:[%s460_s4] ss:$0 sm:$0xff] }
  0x2a   :  { %v271_v24 = vld [vmem:[%s462_s6] ss:$0 sm:$0xff] }
  0x2b   :  { %286 = vmatmul.mubr.msk.bf16.vlgmr.msra.gmra.mxu0 %vm73_vm2, %v64_v2 }
  0x2c   :  { %301 = vmatprep.mubr.msk.bf16.mxu0 %vm386_vm0, %v385_v0  ;;  %292 = vmatpush3.bf16.msra.mxu1 %v313_v5 }
  0x2d   :  { %298 = vmatpush3.bf16.msra.mxu0 %v314_v6 }
  0x2e   :  { %299 = vmatprep.subr.bf16.mxu0 %v385_v0 }
  0x31   :  { %300 = vmatpush3.bf16.msra.mxu0 %v315_v15 }
  0xeb   :  { %v115_v8 = vpop.f32.mrf.mxu0 }
  0xec   :  { %v116_v9 = vadd.f32 %v265_v7, %v115_v8 }
  0xed   :  { %v287_v10 = vpop.f32.mrf.mxu0 }
  0xee   :  { %v121_v11 = vmax.f32 %v116_v9, 0.0 }
  0xef   :  { %v118_v12 = vpop.f32.mrf.mxu0 }
  0xf0   :  { %v122_v13 = vpack.c.bf16 %v121_v11, %v121_v11 }
  0xf1   :  { %v288_v14 = vpop.f32.mrf.mxu0 }
  0xf2   :  { %294 = vmatmul.mubr.msk.bf16.vlgmr.msra.gmra.mxu1 %vm146_vm3, %v122_v13 }
 0x1b2   :  { %v184_v17 = vpop.f32.mrf.mxu1 }
 0x1b3   :  { %v185_v18 = vadd.f32 %v267_v16, %v184_v17 }
 0x1b4   :  { %v295_v19 = vpop.f32.mrf.mxu1 }
 0x1b5   :  { %v190_v20 = vmax.f32 %v185_v18, 0.0 }
 0x1b6   :  { %v187_v21 = vpop.f32.mrf.mxu1 }
 0x1b7   :  { %v191_v22 = vpack.c.bf16 %v190_v20, %v190_v20 }
 0x1b8   :  { %v296_v23 = vpop.f32.mrf.mxu1 }
 0x1b9   :  { %302 = vmatmul.mubr.msk.bf16.vlgmr.msra.gmra.mxu0 %vm146_vm3, %v191_v22 }
 0x279   :  { %v252_v25 = vpop.f32.mrf.mxu0 }
 0x27a   :  { %v253_v26 = vadd.f32 %v271_v24, %v252_v25 }
 0x27b   :  { %v303_v27 = vpop.f32.mrf.mxu0 }
 0x27c   :  { %258 = vst.msk [vmem:[%s463_s7] sm:$0xff] %vm73_vm2, %v253_v26 }
 0x27d   :  { %v255_v28 = vpop.f32.mrf.mxu0 }
 0x27f   :  { %v304_v29 = vpop.f32.mrf.mxu0 }
 0x280   :  { %263 = vsyncpa [#allocation3], 1 }
 0x281   :  { %264 = vsyncpa [#allocation5], 1 }

</bundles_post_ra>
